<compile_context>
chip_gen: v7x
topology: tpu7x:2x2x1
jax: 0.10.0
libtpu: 0.0.40
codegen_flags: <defaults>
</compile_context>

<pallas_src>
import jax
import jax.numpy as jnp
from jax import lax
from jax.experimental import pallas as pl
from jax.experimental.pallas import tpu as pltpu

_LANE = 128
_SUBLANE = 8
_TARGET_BLOCK_BYTES = 2 * 1024 * 1024     # review: 4 MiB also fine on v6e/v7x
_VMEM_LIMIT_BYTES = 32 * 1024 * 1024      # raises v5e's 16 MiB scoped default


# ---------------------------------------------------------------------------
# In-kernel math
# ---------------------------------------------------------------------------
def _mish_f32(x):
    # mish(x) = x * tanh(softplus(x)).  With w = exp(min(x, 20)):
    #   tanh(softplus(x)) = w*(w+2) / (w*(w+2) + 2)
    # Clamp at 20 mirrors PyTorch's softplus threshold (the ratio is already
    # exactly 1.0 in f32 well below 20).  All terms are positive (no
    # cancellation) and den >= 2, so the divide is always well-defined.
    w = jnp.exp(jnp.minimum(x, 20.0))
    num = w * (w + 2.0)
    return x * (num / (num + 2.0))


def _mish_kernel(x_ref, o_ref):
    x = x_ref[...].astype(jnp.float32)
    o_ref[...] = _mish_f32(x).astype(o_ref.dtype)


def _bn_mish_kernel(y_ref, scale_ref, shift_ref, o_ref):
    # Fused BatchNorm affine epilogue + Mish.  scale/shift are (tile_rows, 1)
    # and broadcast along the lane dimension.
    y = y_ref[...].astype(jnp.float32)
    z = y * scale_ref[...] + shift_ref[...]
    o_ref[...] = _mish_f32(z).astype(o_ref.dtype)


def _bn_add_mish_kernel(y_ref, scale_ref, shift_ref, res_ref, o_ref):
    # Fused BatchNorm affine epilogue + residual add + Mish.
    y = y_ref[...].astype(jnp.float32)
    z = y * scale_ref[...] + shift_ref[...] + res_ref[...].astype(jnp.float32)
    o_ref[...] = _mish_f32(z).astype(o_ref.dtype)


# ---------------------------------------------------------------------------
# Tiling helpers
# ---------------------------------------------------------------------------
def _row_tile(rows, row_bytes, target_bytes):
    """Row-block size: a multiple of 8 (or the full row count), ~target_bytes
    per block, and >=2 grid steps whenever the array is big enough so both of
    v7x's TensorCores get work (harmless extra step on single-TC v5e/v6e)."""
    if rows < 2 * _SUBLANE:
        return rows                       # full-extent dim is exempt from /8 rule
    tr = max(_SUBLANE, (target_bytes // max(row_bytes, 1)) // _SUBLANE * _SUBLANE)
    if 2 * tr > rows:
        tr = max(_SUBLANE, (rows // 2) // _SUBLANE * _SUBLANE)
    return tr


# ---------------------------------------------------------------------------
# Standalone Mish (the literal Mish module)
# ---------------------------------------------------------------------------
def mish(x, *, target_block_bytes=_TARGET_BLOCK_BYTES):
    """Elementwise Mish via a Pallas TPU kernel (any float shape/dtype)."""
    orig_shape, dtype = x.shape, x.dtype
    n = x.size
    if n == 0:
        return x
    itemsize = jnp.dtype(dtype).itemsize

    flat = jnp.reshape(x, (-1,))
    n_pad = pl.cdiv(n, _LANE) * _LANE            # pad to a lane multiple only
    if n_pad != n:
        flat = jnp.pad(flat, (0, n_pad - n))

    width = _LANE                                 # widen lanes when it is free
    for w in (1024, 512, 256):
        if n_pad % w == 0:
            width = w
            break
    rows = n_pad // width
    slab = jnp.reshape(flat, (rows, width))

    tr = _row_tile(rows, width * itemsize, target_block_bytes)
    out = pl.pallas_call(
        _mish_kernel,
        out_shape=jax.ShapeDtypeStruct((rows, width), dtype),
        grid_spec=pltpu.PrefetchScalarGridSpec(
            num_scalar_prefetch=0,
            grid=(pl.cdiv(rows, tr),),
            in_specs=[pl.BlockSpec((tr, width), lambda i: (i, 0))],
            out_specs=pl.BlockSpec((tr, width), lambda i: (i, 0))),
        compiler_params=pltpu.CompilerParams(
            dimension_semantics=("parallel",),
            vmem_limit_bytes=_VMEM_LIMIT_BYTES),
    )(slab)

    out = jnp.reshape(out, (-1,))
    if n_pad != n:
        out = out[:n]
    return jnp.reshape(out, orig_shape)


def _mish_ref(x):
    """Pure-JAX reference matching PyTorch x * tanh(softplus(x))."""
    xf = x.astype(jnp.float32)
    sp = jnp.where(xf > 20.0, xf, jnp.log1p(jnp.exp(jnp.minimum(xf, 20.0))))
    return (xf * jnp.tanh(sp)).astype(x.dtype)


# ---------------------------------------------------------------------------
# Fused BatchNorm(affine) [+ residual] + Mish
# ---------------------------------------------------------------------------
def _bn_scale_shift(y, gamma, beta, eps=1e-5):
    # PyTorch BatchNorm2d training-mode forward: per-channel batch statistics
    # (biased variance), affine gamma/beta.
    mean = jnp.mean(y, axis=(0, 2, 3))
    var = jnp.mean(jnp.square(y - mean.reshape(1, -1, 1, 1)), axis=(0, 2, 3))
    scale = gamma * lax.rsqrt(var + eps)
    shift = beta - mean * scale
    return scale, shift


def bn_mish(y, gamma, beta, *, residual=None, eps=1e-5,
            target_block_bytes=_TARGET_BLOCK_BYTES):
    """BatchNorm2d (training-mode stats) + optional residual add + Mish.
    The reductions run in XLA; the per-channel affine, residual add and Mish
    are fused into a single Pallas pass over a lane-dense (N*C, H*W) slab."""
    N, C, H, W = y.shape
    itemsize = jnp.dtype(y.dtype).itemsize

    scale, shift = _bn_scale_shift(y, gamma, beta, eps)
    rows, cols = N * C, H * W
    # Row r of the slab is channel r % C  ->  tile the per-channel scalars.
    scale_rows = jnp.tile(scale.astype(jnp.float32), N).reshape(rows, 1)
    shift_rows = jnp.tile(shift.astype(jnp.float32), N).reshape(rows, 1)

    y2 = y.reshape(rows, cols)                       # free reshape (NCHW order)
    r2 = residual.reshape(rows, cols) if residual is not None else None

    # Lane (last-dim) tiling: a full-extent last dim is always a legal block;
    # only pad to a 128 multiple when the spatial extent is both unaligned and
    # too large for a single full-extent block (rare).
    cap = max(_LANE, (target_block_bytes // (_SUBLANE * itemsize)) // _LANE * _LANE)
    cols_p = cols
    if cols % _LANE == 0:
        tc = min(cols, cap)
    elif cols * _SUBLANE * itemsize > 2 * target_block_bytes:
        cols_p = pl.cdiv(cols, _LANE) * _LANE
        pad = ((0, 0), (0, cols_p - cols))
        y2 = jnp.pad(y2, pad)
        if r2 is not None:
            r2 = jnp.pad(r2, pad)
        tc = min(cols_p, cap)
    else:
        tc = cols                                    # full extent, masked stores
    tr = _row_tile(rows, tc * itemsize, target_block_bytes)
    grid = (pl.cdiv(rows, tr), pl.cdiv(cols_p, tc))

    data_spec = pl.BlockSpec((tr, tc), lambda i, j: (i, j))
    chan_spec = pl.BlockSpec((tr, 1), lambda i, j: (i, 0))

    if r2 is None:
        kernel = _bn_mish_kernel
        in_specs = [data_spec, chan_spec, chan_spec]
        operands = (y2, scale_rows, shift_rows)
    else:
        kernel = _bn_add_mish_kernel
        in_specs = [data_spec, chan_spec, chan_spec, data_spec]
        operands = (y2, scale_rows, shift_rows, r2)

    out = pl.pallas_call(
        kernel,
        out_shape=jax.ShapeDtypeStruct((rows, cols_p), y.dtype),
        grid_spec=pltpu.PrefetchScalarGridSpec(
            num_scalar_prefetch=0, grid=grid,
            in_specs=in_specs, out_specs=data_spec),
        compiler_params=pltpu.CompilerParams(
            dimension_semantics=("parallel", "parallel"),
            vmem_limit_bytes=_VMEM_LIMIT_BYTES),
    )(*operands)

    if cols_p != cols:
        out = out[:, :cols]
    return out.reshape(N, C, H, W)


# ---------------------------------------------------------------------------
# CSPFirst forward (convs via lax/XLA, fused BN+Mish via Pallas)
# ---------------------------------------------------------------------------
def _conv2d(x, w, stride, padding):
    return lax.conv_general_dilated(
        x, w,
        window_strides=(stride, stride),
        padding=[(padding, padding), (padding, padding)],
        dimension_numbers=("NCHW", "OIHW", "NCHW"))


def csp_first_forward(x, params):
    def bcm(h, p, stride, pad):          # BN_Conv_Mish
        return bn_mish(_conv2d(h, p["w"], stride, pad), p["gamma"], p["beta"])

    h = bcm(x, params["dsample"], 2, 1)                   # 3x3 s2 p1
    out_0 = bcm(h, params["trans_0"], 1, 0)               # 1x1
    out_1 = bcm(h, params["trans_1"], 1, 0)               # 1x1
    blk = params["block"]                                 # ResidualBlock
    t = bcm(out_1, blk["conv1"], 1, 0)
    t = _conv2d(t, blk["conv2_w"], 1, 1)
    out_1 = bn_mish(t, blk["bn"]["gamma"], blk["bn"]["beta"], residual=out_1)
    out = jnp.concatenate([out_0, out_1], axis=1)
    return bcm(out, params["trans_cat"], 1, 0)            # 1x1


def _bn_mish_ref(y, gamma, beta, residual=None, eps=1e-5):
    scale, shift = _bn_scale_shift(y, gamma, beta, eps)
    z = y * scale.reshape(1, -1, 1, 1) + shift.reshape(1, -1, 1, 1)
    if residual is not None:
        z = z + residual
    return _mish_ref(z)


def csp_first_forward_ref(x, params):
    def bcm(h, p, stride, pad):
        return _bn_mish_ref(_conv2d(h, p["w"], stride, pad), p["gamma"], p["beta"])

    h = bcm(x, params["dsample"], 2, 1)
    out_0 = bcm(h, params["trans_0"], 1, 0)
    out_1 = bcm(h, params["trans_1"], 1, 0)
    blk = params["block"]
    t = bcm(out_1, blk["conv1"], 1, 0)
    t = _conv2d(t, blk["conv2_w"], 1, 1)
    out_1 = _bn_mish_ref(t, blk["bn"]["gamma"], blk["bn"]["beta"], residual=out_1)
    out = jnp.concatenate([out_0, out_1], axis=1)
    return bcm(out, params["trans_cat"], 1, 0)


# ---------------------------------------------------------------------------
# Parameter init (matches PyTorch defaults: kaiming-uniform conv, BN gamma=1, beta=0)
# ---------------------------------------------------------------------------
def _conv_init(key, out_c, in_c, kh, kw):
    fan_in = in_c * kh * kw
    bound = 1.0 / (fan_in ** 0.5)
    return jax.random.uniform(key, (out_c, in_c, kh, kw), jnp.float32, -bound, bound)


def init_csp_first_params(key, in_channels, out_channels):
    keys = jax.random.split(key, 6)
    inner = out_channels // 2

    def bn(c):
        return {"gamma": jnp.ones((c,), jnp.float32),
                "beta": jnp.zeros((c,), jnp.float32)}

    return {
        "dsample": {"w": _conv_init(keys[0], out_channels, in_channels, 3, 3), **bn(out_channels)},
        "trans_0": {"w": _conv_init(keys[1], out_channels, out_channels, 1, 1), **bn(out_channels)},
        "trans_1": {"w": _conv_init(keys[2], out_channels, out_channels, 1, 1), **bn(out_channels)},
        "block": {
            "conv1": {"w": _conv_init(keys[3], inner, out_channels, 1, 1), **bn(inner)},
            "conv2_w": _conv_init(keys[4], out_channels, inner, 3, 3),
            "bn": bn(out_channels),
        },
        "trans_cat": {"w": _conv_init(keys[5], out_channels, 2 * out_channels, 1, 1), **bn(out_channels)},
    }


# ---------------------------------------------------------------------------
if __name__ == "__main__":
    key = jax.random.PRNGKey(0)
    k_x, k_p, k_z = jax.random.split(key, 3)

    in_channels, out_channels = 4, 8
    x = jax.random.normal(k_x, (2, in_channels, 16, 16), dtype=jnp.float32)
    params = init_csp_first_params(k_p, in_channels, out_channels)

    # Full CSPFirst forward with the fused Pallas BN+Mish kernels.
    fwd = jax.jit(csp_first_forward)
    y = fwd(x, params)
    jax.block_until_ready(y)
    assert y.shape == (2, out_channels, 8, 8)
    assert bool(jnp.all(jnp.isfinite(y)))

    # Standalone Mish kernel checks: ragged size (lane-pad path) and a size
    # whose row count forces multiple blocks with a masked partial tail.
    z_small = jax.random.normal(k_z, (3, 5, 7, 11), dtype=jnp.float32) * 4.0
    assert jnp.allclose(mish(z_small), _mish_ref(z_small), atol=1e-5, rtol=1e-4)

    z_big = jax.random.normal(k_z, (1, 1, 700, 801), dtype=jnp.float32) * 3.0
    assert jnp.allclose(mish(z_big), _mish_ref(z_big), atol=1e-5, rtol=1e-4)

    # Full-module check against a pure-JAX reference (unfused BN affine + tanh(softplus) Mish).
    y_ref = csp_first_forward_ref(x, params)
    assert jnp.allclose(y, y_ref, atol=1e-4, rtol=1e-4)

    print("KERNEL_OK")
</pallas_src>

<mosaic_0001>
module attributes {stable_mosaic.version = 11 : i64} {
  func.func @_bn_mish_kernel(%arg0: i32, %arg1: i32, %arg2: memref<8x64xf32, #tpu.memory_space<vmem>>, %arg3: memref<8x1xf32, #tpu.memory_space<vmem>>, %arg4: memref<8x1xf32, #tpu.memory_space<vmem>>, %arg5: memref<8x64xf32, #tpu.memory_space<vmem>>) attributes {dimension_semantics = [#tpu.dimension_semantics<parallel>, #tpu.dimension_semantics<parallel>], iteration_bounds = array<i64: 2, 1>, scalar_prefetch = 0 : i64, scratch_operands = 0 : i64, tpu.core_type = #tpu.core_type<tc>, window_params = [{transform_indices = @transform_0, window_bounds = array<i64: 8, 64>}, {transform_indices = @transform_1, window_bounds = array<i64: 8, 1>}, {transform_indices = @transform_2, window_bounds = array<i64: 8, 1>}, {transform_indices = @transform_3, window_bounds = array<i64: 8, 64>}]} {
    %c0 = arith.constant 0 : index
    %c0_0 = arith.constant 0 : index
    %0 = vector.load %arg2[%c0, %c0_0] : memref<8x64xf32, #tpu.memory_space<vmem>>, vector<8x64xf32>
    %c0_1 = arith.constant 0 : index
    %c0_2 = arith.constant 0 : index
    %1 = vector.load %arg3[%c0_1, %c0_2] : memref<8x1xf32, #tpu.memory_space<vmem>>, vector<8x1xf32>
    %2 = vector.broadcast %1 : vector<8x1xf32> to vector<8x64xf32>
    %3 = arith.mulf %0, %2 : vector<8x64xf32>
    %c0_3 = arith.constant 0 : index
    %c0_4 = arith.constant 0 : index
    %4 = vector.load %arg4[%c0_3, %c0_4] : memref<8x1xf32, #tpu.memory_space<vmem>>, vector<8x1xf32>
    %5 = vector.broadcast %4 : vector<8x1xf32> to vector<8x64xf32>
    %6 = arith.addf %3, %5 : vector<8x64xf32>
    %cst = arith.constant 2.000000e+01 : f32
    %7 = vector.broadcast %cst : f32 to vector<8x64xf32>
    %8 = arith.minimumf %6, %7 : vector<8x64xf32>
    %9 = math.exp %8 : vector<8x64xf32>
    %cst_5 = arith.constant 2.000000e+00 : f32
    %10 = vector.broadcast %cst_5 : f32 to vector<8x64xf32>
    %11 = arith.addf %9, %10 : vector<8x64xf32>
    %12 = arith.mulf %9, %11 : vector<8x64xf32>
    %cst_6 = arith.constant 2.000000e+00 : f32
    %13 = vector.broadcast %cst_6 : f32 to vector<8x64xf32>
    %14 = arith.addf %12, %13 : vector<8x64xf32>
    %15 = arith.divf %12, %14 : vector<8x64xf32>
    %16 = arith.mulf %6, %15 : vector<8x64xf32>
    %c0_7 = arith.constant 0 : index
    %c0_8 = arith.constant 0 : index
    %17 = vector.load %arg5[%c0_7, %c0_8] : memref<8x64xf32, #tpu.memory_space<vmem>>, vector<8x64xf32>
    tpu.vector_store %arg5[%c0_7, %c0_8], %16 {strides = array<i32>} : memref<8x64xf32, #tpu.memory_space<vmem>>, vector<8x64xf32>,
    return
  }
  func.func @transform_0(%arg0: i32, %arg1: i32) -> (i32, i32) {
    %c0_i32 = arith.constant 0 : i32
    return %arg0, %arg1 : i32, i32
  }
  func.func @transform_1(%arg0: i32, %arg1: i32) -> (i32, i32) {
    %c0_i32 = arith.constant 0 : i32
    %c0_i32_0 = arith.constant 0 : i32
    return %arg0, %c0_i32 : i32, i32
  }
  func.func @transform_2(%arg0: i32, %arg1: i32) -> (i32, i32) {
    %c0_i32 = arith.constant 0 : i32
    %c0_i32_0 = arith.constant 0 : i32
    return %arg0, %c0_i32 : i32, i32
  }
  func.func @transform_3(%arg0: i32, %arg1: i32) -> (i32, i32) {
    %c0_i32 = arith.constant 0 : i32
    return %arg0, %arg1 : i32, i32
  }
}

module attributes {stable_mosaic.version = 11 : i64} {
  func.func @_bn_mish_kernel(%arg0: i32, %arg1: i32, %arg2: memref<8x64xf32, #tpu.memory_space<vmem>>, %arg3: memref<8x1xf32, #tpu.memory_space<vmem>>, %arg4: memref<8x1xf32, #tpu.memory_space<vmem>>, %arg5: memref<8x64xf32, #tpu.memory_space<vmem>>) attributes {dimension_semantics = [#tpu.dimension_semantics<parallel>, #tpu.dimension_semantics<parallel>], iteration_bounds = array<i64: 1, 1>, scalar_prefetch = 0 : i64, scratch_operands = 0 : i64, tpu.core_type = #tpu.core_type<tc>, window_params = [{transform_indices = @transform_0, window_bounds = array<i64: 8, 64>}, {transform_indices = @transform_1, window_bounds = array<i64: 8, 1>}, {transform_indices = @transform_2, window_bounds = array<i64: 8, 1>}, {transform_indices = @transform_3, window_bounds = array<i64: 8, 64>}]} {
    %c0 = arith.constant 0 : index
    %c0_0 = arith.constant 0 : index
    %0 = vector.load %arg2[%c0, %c0_0] : memref<8x64xf32, #tpu.memory_space<vmem>>, vector<8x64xf32>
    %c0_1 = arith.constant 0 : index
    %c0_2 = arith.constant 0 : index
    %1 = vector.load %arg3[%c0_1, %c0_2] : memref<8x1xf32, #tpu.memory_space<vmem>>, vector<8x1xf32>
    %2 = vector.broadcast %1 : vector<8x1xf32> to vector<8x64xf32>
    %3 = arith.mulf %0, %2 : vector<8x64xf32>
    %c0_3 = arith.constant 0 : index
    %c0_4 = arith.constant 0 : index
    %4 = vector.load %arg4[%c0_3, %c0_4] : memref<8x1xf32, #tpu.memory_space<vmem>>, vector<8x1xf32>
    %5 = vector.broadcast %4 : vector<8x1xf32> to vector<8x64xf32>
    %6 = arith.addf %3, %5 : vector<8x64xf32>
    %cst = arith.constant 2.000000e+01 : f32
    %7 = vector.broadcast %cst : f32 to vector<8x64xf32>
    %8 = arith.minimumf %6, %7 : vector<8x64xf32>
    %9 = math.exp %8 : vector<8x64xf32>
    %cst_5 = arith.constant 2.000000e+00 : f32
    %10 = vector.broadcast %cst_5 : f32 to vector<8x64xf32>
    %11 = arith.addf %9, %10 : vector<8x64xf32>
    %12 = arith.mulf %9, %11 : vector<8x64xf32>
    %cst_6 = arith.constant 2.000000e+00 : f32
    %13 = vector.broadcast %cst_6 : f32 to vector<8x64xf32>
    %14 = arith.addf %12, %13 : vector<8x64xf32>
    %15 = arith.divf %12, %14 : vector<8x64xf32>
    %16 = arith.mulf %6, %15 : vector<8x64xf32>
    %c0_7 = arith.constant 0 : index
    %c0_8 = arith.constant 0 : index
    %17 = vector.load %arg5[%c0_7, %c0_8] : memref<8x64xf32, #tpu.memory_space<vmem>>, vector<8x64xf32>
    tpu.vector_store %arg5[%c0_7, %c0_8], %16 {strides = array<i32>} : memref<8x64xf32, #tpu.memory_space<vmem>>, vector<8x64xf32>,
    return
  }
  func.func @transform_0(%arg0: i32, %arg1: i32) -> (i32, i32) {
    %c0_i32 = arith.constant 0 : i32
    return %arg0, %arg1 : i32, i32
  }
  func.func @transform_1(%arg0: i32, %arg1: i32) -> (i32, i32) {
    %c0_i32 = arith.constant 0 : i32
    %c0_i32_0 = arith.constant 0 : i32
    return %arg0, %c0_i32 : i32, i32
  }
  func.func @transform_2(%arg0: i32, %arg1: i32) -> (i32, i32) {
    %c0_i32 = arith.constant 0 : i32
    %c0_i32_0 = arith.constant 0 : i32
    return %arg0, %c0_i32 : i32, i32
  }
  func.func @transform_3(%arg0: i32, %arg1: i32) -> (i32, i32) {
    %c0_i32 = arith.constant 0 : i32
    return %arg0, %arg1 : i32, i32
  }
}

module attributes {stable_mosaic.version = 11 : i64} {
  func.func @_bn_add_mish_kernel(%arg0: i32, %arg1: i32, %arg2: memref<8x64xf32, #tpu.memory_space<vmem>>, %arg3: memref<8x1xf32, #tpu.memory_space<vmem>>, %arg4: memref<8x1xf32, #tpu.memory_space<vmem>>, %arg5: memref<8x64xf32, #tpu.memory_space<vmem>>, %arg6: memref<8x64xf32, #tpu.memory_space<vmem>>) attributes {dimension_semantics = [#tpu.dimension_semantics<parallel>, #tpu.dimension_semantics<parallel>], iteration_bounds = array<i64: 2, 1>, scalar_prefetch = 0 : i64, scratch_operands = 0 : i64, tpu.core_type = #tpu.core_type<tc>, window_params = [{transform_indices = @transform_0, window_bounds = array<i64: 8, 64>}, {transform_indices = @transform_1, window_bounds = array<i64: 8, 1>}, {transform_indices = @transform_2, window_bounds = array<i64: 8, 1>}, {transform_indices = @transform_3, window_bounds = array<i64: 8, 64>}, {transform_indices = @transform_4, window_bounds = array<i64: 8, 64>}]} {
    %c0 = arith.constant 0 : index
    %c0_0 = arith.constant 0 : index
    %0 = vector.load %arg2[%c0, %c0_0] : memref<8x64xf32, #tpu.memory_space<vmem>>, vector<8x64xf32>
    %c0_1 = arith.constant 0 : index
    %c0_2 = arith.constant 0 : index
    %1 = vector.load %arg3[%c0_1, %c0_2] : memref<8x1xf32, #tpu.memory_space<vmem>>, vector<8x1xf32>
    %2 = vector.broadcast %1 : vector<8x1xf32> to vector<8x64xf32>
    %3 = arith.mulf %0, %2 : vector<8x64xf32>
    %c0_3 = arith.constant 0 : index
    %c0_4 = arith.constant 0 : index
    %4 = vector.load %arg4[%c0_3, %c0_4] : memref<8x1xf32, #tpu.memory_space<vmem>>, vector<8x1xf32>
    %5 = vector.broadcast %4 : vector<8x1xf32> to vector<8x64xf32>
    %6 = arith.addf %3, %5 : vector<8x64xf32>
    %c0_5 = arith.constant 0 : index
    %c0_6 = arith.constant 0 : index
    %7 = vector.load %arg5[%c0_5, %c0_6] : memref<8x64xf32, #tpu.memory_space<vmem>>, vector<8x64xf32>
    %8 = arith.addf %6, %7 : vector<8x64xf32>
    %cst = arith.constant 2.000000e+01 : f32
    %9 = vector.broadcast %cst : f32 to vector<8x64xf32>
    %10 = arith.minimumf %8, %9 : vector<8x64xf32>
    %11 = math.exp %10 : vector<8x64xf32>
    %cst_7 = arith.constant 2.000000e+00 : f32
    %12 = vector.broadcast %cst_7 : f32 to vector<8x64xf32>
    %13 = arith.addf %11, %12 : vector<8x64xf32>
    %14 = arith.mulf %11, %13 : vector<8x64xf32>
    %cst_8 = arith.constant 2.000000e+00 : f32
    %15 = vector.broadcast %cst_8 : f32 to vector<8x64xf32>
    %16 = arith.addf %14, %15 : vector<8x64xf32>
    %17 = arith.divf %14, %16 : vector<8x64xf32>
    %18 = arith.mulf %8, %17 : vector<8x64xf32>
    %c0_9 = arith.constant 0 : index
    %c0_10 = arith.constant 0 : index
    %19 = vector.load %arg6[%c0_9, %c0_10] : memref<8x64xf32, #tpu.memory_space<vmem>>, vector<8x64xf32>
    tpu.vector_store %arg6[%c0_9, %c0_10], %18 {strides = array<i32>} : memref<8x64xf32, #tpu.memory_space<vmem>>, vector<8x64xf32>,
    return
  }
  func.func @transform_0(%arg0: i32, %arg1: i32) -> (i32, i32) {
    %c0_i32 = arith.constant 0 : i32
    return %arg0, %arg1 : i32, i32
  }
  func.func @transform_1(%arg0: i32, %arg1: i32) -> (i32, i32) {
    %c0_i32 = arith.constant 0 : i32
    %c0_i32_0 = arith.constant 0 : i32
    return %arg0, %c0_i32 : i32, i32
  }
  func.func @transform_2(%arg0: i32, %arg1: i32) -> (i32, i32) {
    %c0_i32 = arith.constant 0 : i32
    %c0_i32_0 = arith.constant 0 : i32
    return %arg0, %c0_i32 : i32, i32
  }
  func.func @transform_3(%arg0: i32, %arg1: i32) -> (i32, i32) {
    %c0_i32 = arith.constant 0 : i32
    return %arg0, %arg1 : i32, i32
  }
  func.func @transform_4(%arg0: i32, %arg1: i32) -> (i32, i32) {
    %c0_i32 = arith.constant 0 : i32
    return %arg0, %arg1 : i32, i32
  }
}

</mosaic_0001>

<bundles_post_ra>
// kernel: tile.68
= control target key start
LH: loop header
LB: loop body
LE: loop exit
PB: predicated region body
PF: predicated region fallthrough
CT: control target
= control target key end

     0   :  { %s22_s0 = inlined_call_operand.vmem [shape: f32[8], index: 0, kind: input, shape index: {}]   ;;  %s23_s1 = inlined_call_operand.vmem [shape: f32[2,8], index: 1, kind: output, shape index: {}]  }
   0x1   :  { %v4_v0 = vld [vmem:[%s22_s0] ss:$0 sm:$0xff] }
   0x2   :  { %5 = vst [vmem:[%s23_s1] sm:$0x3] %v4_v0 }

// kernel: tile.0
= control target key start
LH: loop header
LB: loop body
LE: loop exit
PB: predicated region body
PF: predicated region fallthrough
CT: control target
= control target key end

     0   :  { %s66_s8 = smov 125   ;;  %vm7_vm0 = vcmask 7168   ;;  %s67_s11 = smov 126   ;;  %s117_s0 = inlined_call_operand.vmem [shape: f32[2,8], index: 0, kind: input, shape index: {}]   ;;  %s118_s1 = inlined_call_operand.vmem [shape: f32[16,1], index: 1, kind: output, shape index: {}]  }
   0x1   :  { %v4_v0 = vld [vmem:[%s117_s0] sm:$0x3]  ;;  %s65_s0 = smov 127   ;;  %s68_s12 = smov 124  }
   0x2   :  { %5 = vst [vmem:[#allocation0] sm:$0x3] %v4_v0  ;;  %s69_s13 = smov 123   ;;  %s70_s14 = smov 122  }
   0x3   :  { %s71_s15 = smov 121  }
   0x9   :  { %v9_v1 = vld [vmem:[#allocation0] sm:$0x3]  }
   0xa   :  { %v21_v2 = vld [vmem:[#allocation0] sm:$0x3]   ;;  %10 = vrot.lane.b32.xlu0 %v9_v1, %s65_s0 }
   0xb   :  { %22 = vrot.lane.b32.xlu1 %v21_v2, %s66_s8  ;;  %v15_v3 = vld [vmem:[#allocation0] sm:$0x3]  }
   0xc   :  { %v27_v4 = vld [vmem:[#allocation0] sm:$0x3]  }
   0xd   :  { %v6_v5 = vld [vmem:[#allocation0] sm:$0x3]  }
   0xe   :  { %8 = vst.msk [vmem:[%s118_s1] ss:$8 sm:$0x3] %vm7_vm0, %v6_v5   ;;  %16 = vrot.lane.b32.xlu0 %v15_v3, %s67_s11  ;;  %v33_v6 = vld [vmem:[#allocation0] sm:$0x3]  }
   0xf   :  { %28 = vrot.lane.b32.xlu1 %v27_v4, %s68_s12  ;;  %v39_v7 = vld [vmem:[#allocation0] sm:$0x3]  }
  0x10   :  { %v45_v8 = vld [vmem:[#allocation0] sm:$0x3]  }
  0x12   :  { %34 = vrot.lane.b32.xlu0 %v33_v6, %s69_s13 }
  0x13   :  { %40 = vrot.lane.b32.xlu1 %v39_v7, %s70_s14 }
  0x16   :  { %46 = vrot.lane.b32.xlu0 %v45_v8, %s71_s15 }
  0x7c   :  { %v11_v9 = vpop.permute.xlu0 %10  }
  0x7d   :  { %v23_v10 = vpop.permute.xlu1 %22   ;;  %51 = vst.msk [vmem:[%s118_s1 + $0x1] ss:$8 sm:$0x3] %vm7_vm0, %v11_v9  }
  0x7e   :  { %53 = vst.msk [vmem:[%s118_s1 + $0x3] ss:$8 sm:$0x3] %vm7_vm0, %v23_v10  }
  0x80   :  { %v17_v11 = vpop.permute.xlu0 %16  }
  0x81   :  { %v29_v12 = vpop.permute.xlu1 %28   ;;  %52 = vst.msk [vmem:[%s118_s1 + $0x2] ss:$8 sm:$0x3] %vm7_vm0, %v17_v11  }
  0x82   :  { %54 = vst.msk [vmem:[%s118_s1 + $0x4] ss:$8 sm:$0x3] %vm7_vm0, %v29_v12  }
  0x84   :  { %v35_v13 = vpop.permute.xlu0 %34  }
  0x85   :  { %v41_v14 = vpop.permute.xlu1 %40   ;;  %55 = vst.msk [vmem:[%s118_s1 + $0x5] ss:$8 sm:$0x3] %vm7_vm0, %v35_v13  }
  0x86   :  { %56 = vst.msk [vmem:[%s118_s1 + $0x6] ss:$8 sm:$0x3] %vm7_vm0, %v41_v14  }
  0x88   :  { %v47_v15 = vpop.permute.xlu0 %46  }
  0x89   :  { %57 = vst.msk [vmem:[%s118_s1 + $0x7] ss:$8 sm:$0x3] %vm7_vm0, %v47_v15  }

// kernel: csp_first_forward.6
= control target key start
LH: loop header
LB: loop body
LE: loop exit
PB: predicated region body
PF: predicated region fallthrough
CT: control target
= control target key end

     0   :  { %s441_s12 = smov 0   ;;  %s443_s13 = smov 0   ;;  %s480_s0 = inlined_call_operand.vmem [shape: f32[16,64], index: 0, kind: input, shape index: {}]   ;;  %s481_s1 = inlined_call_operand.vmem [shape: f32[16,1], index: 1, kind: input, shape index: {}]   ;;  %s482_s2 = inlined_call_operand.vmem [shape: f32[16,1], index: 2, kind: input, shape index: {}]   ;;  %s483_s3 = inlined_call_operand.vmem [shape: f32[16,64], index: 3, kind: output, shape index: {}]  }
   0x1   :  { %s445_s14 = smov 0  }
   0x2 LB: > { %s25_s15 = sadd.s32 1, %s414_s13  ;;  %p359_p0 = scmp.ge.s32.totalorder %s418_s14, 1  ;;  %s418_s14 = sphi %s445_s14, %s13_s14   ;;  %s414_s13 = sphi %s443_s13, %s485_s13   ;;  %s410_s12 = sphi %s441_s12, %s484_s12  }
   0x3   : > { %p27_p1 = scmp.ge.s32.totalorder %s25_s15, 2  ;;  %p173_p2 = scmp.lt.s32.totalorder %s418_s14, 3 }
   0x5   : > { %s487_s15 = smov (%p27_p1, %s25_s15), 0  ;;  %p174_p3 = pnand %p359_p0, %p173_p2 }
   0x6   : > { %p209_p4 = scmp.lt.s32.totalorder (!%p174_p3), %s410_s12, 1  ;;  %v420_v0 = vmov (!%p174_p3), 0   ;;  %vm255_vm0 = vcmask (!%p174_p3), 523264  }
   0x7   : > { %177 = sbr.rel (%p174_p3) target bundleno = 189 (0xbd), region = 32  ;;  %391 = vset.pattern.permute.xlu0 (!%p174_p3), %v420_v0 }
   0xe   : > { %s489_s12 = smov (!%p209_p4, %s410_s12), 1 }
   0xf   : > { %s360_s16 = sshll.u32 %s489_s12, 3 }
  0x10   : > { %s219_s19 = scalar_lea.vmem %s481_s1, %s360_s16  ;;  %s223_s22 = scalar_lea.vmem %s482_s2, %s360_s16 }
  0x11   : > { %v232_v1 = vld [vmem:[%s219_s19] sm:$0xff]  ;;  %s215_s25 = scalar_lea.vmem %s480_s0, %s360_s16  ;;  %s230_s28 = scalar_lea.vmem %s483_s3, %s360_s16 }
  0x12   : > { %235 = vperm.xlu0 %391, %v232_v1   ;;  %v239_v2 = vld [vmem:[%s223_s22] sm:$0xff] }
  0x13   : > { %v231_v4 = vld [vmem:[%s215_s25] sm:$0xff] }
  0x16   : > { %242 = vperm.xlu0 %391, %v239_v2  }
  0x91   : > { %v236_v3 = vpop.permute.xlu0 %235 }
  0x92   : > { %v238_v5 = vmul.f32 %v236_v3, %v231_v4 }
  0x95   : > { %v243_v6 = vpop.permute.xlu0 %242 }
  0x96   : > { %v245_v7 = vadd.f32 %v243_v6, %v238_v5 }
  0x98   : > { %v246_v8 = vmin.f32 %v245_v7, 20.0 }
  0x9a   : > { %v247_v9 = vmul.f32 1.442695, %v246_v8 }
  0x9c   : > { %392 = vpow2.f32 %v247_v9 }
  0xa6   : > { %v393_v10 = vpop.eup %392 }
  0xa7   : > { %v249_v11 = vadd.f32 2.0, %v393_v10 }
  0xa9   : > { %v250_v12 = vmul.f32 %v393_v10, %v249_v11 }
  0xab   : > { %v251_v13 = vadd.f32 2.0, %v250_v12 }
  0xad   : > { %394 = vrcp.f32 %v251_v13 }
  0xb7   : > { %v395_v14 = vpop.eup %394 }
  0xb8   : > { %v253_v15 = vmul.f32 %v395_v14, %v250_v12 }
  0xba   : > { %v254_v16 = vmul.f32 %v253_v15, %v245_v7 }
  0xbc   : > { %256 = vst.msk [vmem:[%s230_s28] sm:$0xff] %vm255_vm0, %v254_v16 }
  0xbd PF: > { %s13_s14 = sadd.s32 1, %s418_s14   ;;  %s484_s12 = smov %s414_s13 }
  0xbe   : > { %p10_p5 = scmp.ge.s32.totalorder %s13_s14, 4   ;;  %s485_s13 = smov %s487_s15 }
  0xc0   :  { %12 = sbr.rel (!%p10_p5) target bundleno = 2 (0x2), region = 68 }

// kernel: tile.98
= control target key start
LH: loop header
LB: loop body
LE: loop exit
PB: predicated region body
PF: predicated region fallthrough
CT: control target
= control target key end

     0   :  { %s22_s0 = inlined_call_operand.vmem [shape: f32[4], index: 0, kind: input, shape index: {}]   ;;  %s23_s1 = inlined_call_operand.vmem [shape: f32[2,4], index: 1, kind: output, shape index: {}]  }
   0x1   :  { %v4_v0 = vld [vmem:[%s22_s0] ss:$0 sm:$0xff] }
   0x2   :  { %5 = vst [vmem:[%s23_s1] sm:$0x3] %v4_v0 }

// kernel: tile.6
= control target key start
LH: loop header
LB: loop body
LE: loop exit
PB: predicated region body
PF: predicated region fallthrough
CT: control target
= control target key end

     0   :  { %s34_s8 = smov 125   ;;  %vm7_vm0 = vcmask 7168   ;;  %s35_s11 = smov 126   ;;  %s61_s0 = inlined_call_operand.vmem [shape: f32[2,4], index: 0, kind: input, shape index: {}]   ;;  %s62_s1 = inlined_call_operand.vmem [shape: f32[8,1], index: 1, kind: output, shape index: {}]  }
   0x1   :  { %v4_v0 = vld [vmem:[%s61_s0] sm:$0x3]  ;;  %s33_s0 = smov 127  }
   0x2   :  { %5 = vst [vmem:[#allocation0] sm:$0x3] %v4_v0 }
   0x9   :  { %v9_v1 = vld [vmem:[#allocation0] sm:$0x3]  }
   0xa   :  { %v21_v2 = vld [vmem:[#allocation0] sm:$0x3]   ;;  %10 = vrot.lane.b32.xlu0 %v9_v1, %s33_s0 }
   0xb   :  { %22 = vrot.lane.b32.xlu1 %v21_v2, %s34_s8  ;;  %v6_v3 = vld [vmem:[#allocation0] sm:$0x3]  }
   0xc   :  { %v15_v4 = vld [vmem:[#allocation0] sm:$0x3]   ;;  %8 = vst.msk [vmem:[%s62_s1] ss:$4 sm:$0x3] %vm7_vm0, %v6_v3  }
   0xe   :  { %16 = vrot.lane.b32.xlu0 %v15_v4, %s35_s11 }
  0x7c   :  { %v11_v5 = vpop.permute.xlu0 %10  }
  0x7d   :  { %v23_v6 = vpop.permute.xlu1 %22   ;;  %27 = vst.msk [vmem:[%s62_s1 + $0x1] ss:$4 sm:$0x3] %vm7_vm0, %v11_v5  }
  0x7e   :  { %29 = vst.msk [vmem:[%s62_s1 + $0x3] ss:$4 sm:$0x3] %vm7_vm0, %v23_v6  }
  0x80   :  { %v17_v7 = vpop.permute.xlu0 %16  }
  0x81   :  { %28 = vst.msk [vmem:[%s62_s1 + $0x2] ss:$4 sm:$0x3] %vm7_vm0, %v17_v7  }

// kernel: csp_first_forward.9
= control target key start
LH: loop header
LB: loop body
LE: loop exit
PB: predicated region body
PF: predicated region fallthrough
CT: control target
= control target key end

     0   :  { %v50_v0 = vmov 0   ;;  %vm38_vm0 = vcmask 523264   ;;  %s83_s1 = inlined_call_operand.vmem [shape: f32[8,1], index: 1, kind: input, shape index: {}]   ;;  %s84_s2 = inlined_call_operand.vmem [shape: f32[8,1], index: 2, kind: input, shape index: {}]   ;;  %s85_s0 = inlined_call_operand.vmem [shape: f32[8,64], index: 0, kind: input, shape index: {}]   ;;  %s86_s3 = inlined_call_operand.vmem [shape: f32[8,64], index: 3, kind: output, shape index: {}]  }
   0x1   :  { %45 = vset.pattern.permute.xlu0 %v50_v0  ;;  %v15_v1 = vld [vmem:[%s83_s1] sm:$0xff] }
   0x2   :  { %18 = vperm.xlu0 %45, %v15_v1   ;;  %v22_v2 = vld [vmem:[%s84_s2] sm:$0xff] }
   0x3   :  { %v14_v4 = vld [vmem:[%s85_s0] sm:$0xff] }
   0x6   :  { %25 = vperm.xlu0 %45, %v22_v2  }
  0x81   :  { %v19_v3 = vpop.permute.xlu0 %18 }
  0x82   :  { %v21_v5 = vmul.f32 %v19_v3, %v14_v4 }
  0x85   :  { %v26_v6 = vpop.permute.xlu0 %25 }
  0x86   :  { %v28_v7 = vadd.f32 %v26_v6, %v21_v5 }
  0x88   :  { %v29_v8 = vmin.f32 %v28_v7, 20.0 }
  0x8a   :  { %v30_v9 = vmul.f32 1.442695, %v29_v8 }
  0x8c   :  { %46 = vpow2.f32 %v30_v9 }
  0x96   :  { %v47_v10 = vpop.eup %46 }
  0x97   :  { %v32_v11 = vadd.f32 2.0, %v47_v10 }
  0x99   :  { %v33_v12 = vmul.f32 %v47_v10, %v32_v11 }
  0x9b   :  { %v34_v13 = vadd.f32 2.0, %v33_v12 }
  0x9d   :  { %48 = vrcp.f32 %v34_v13 }
  0xa7   :  { %v49_v14 = vpop.eup %48 }
  0xa8   :  { %v36_v15 = vmul.f32 %v49_v14, %v33_v12 }
  0xaa   :  { %v37_v16 = vmul.f32 %v36_v15, %v28_v7 }
  0xac   :  { %39 = vst.msk [vmem:[%s86_s3] sm:$0xff] %vm38_vm0, %v37_v16 }

// kernel: csp_first_forward.10
= control target key start
LH: loop header
LB: loop body
LE: loop exit
PB: predicated region body
PF: predicated region fallthrough
CT: control target
= control target key end

     0   :  { %s519_s15 = smov 0   ;;  %s521_s16 = smov 0   ;;  %s568_s0 = inlined_call_operand.vmem [shape: f32[16,64], index: 0, kind: input, shape index: {}]   ;;  %s569_s1 = inlined_call_operand.vmem [shape: f32[16,1], index: 1, kind: input, shape index: {}]   ;;  %s570_s2 = inlined_call_operand.vmem [shape: f32[16,1], index: 2, kind: input, shape index: {}]   ;;  %s571_s3 = inlined_call_operand.vmem [shape: f32[16,64], index: 3, kind: input, shape index: {}]   ;;  %s572_s4 = inlined_call_operand.vmem [shape: f32[16,64], index: 4, kind: output, shape index: {}]  }
   0x1   :  { %s523_s17 = smov 0  }
   0x2 LB: > { %s26_s18 = sadd.s32 1, %s487_s16  ;;  %p431_p0 = scmp.ge.s32.totalorder %s491_s17, 1  ;;  %s491_s17 = sphi %s523_s17, %s14_s17   ;;  %s487_s16 = sphi %s521_s16, %s574_s16   ;;  %s483_s15 = sphi %s519_s15, %s573_s15  }
   0x3   : > { %p28_p1 = scmp.ge.s32.totalorder %s26_s18, 2  ;;  %p212_p2 = scmp.lt.s32.totalorder %s491_s17, 3 }
   0x5   : > { %s576_s18 = smov (%p28_p1, %s26_s18), 0  ;;  %p213_p3 = pnand %p431_p0, %p212_p2 }
   0x6   : > { %p257_p4 = scmp.lt.s32.totalorder (!%p213_p3), %s483_s15, 1  ;;  %v493_v0 = vmov (!%p213_p3), 0   ;;  %vm312_vm0 = vcmask (!%p213_p3), 523264  }
   0x7   : > { %216 = sbr.rel (%p213_p3) target bundleno = 191 (0xbf), region = 36  ;;  %464 = vset.pattern.permute.xlu0 (!%p213_p3), %v493_v0 }
   0xe   : > { %s578_s15 = smov (!%p257_p4, %s483_s15), 1 }
   0xf   : > { %s537_s19 = sshll.u32 %s578_s15, 3 }
  0x10   : > { %s267_s22 = scalar_lea.vmem %s569_s1, %s537_s19  ;;  %s271_s25 = scalar_lea.vmem %s570_s2, %s537_s19 }
  0x11   : > { %v287_v1 = vld [vmem:[%s267_s22] sm:$0xff]  ;;  %s263_s28 = scalar_lea.vmem %s568_s0, %s537_s19  ;;  %s278_s5 = scalar_lea.vmem %s571_s3, %s537_s19 }
  0x12   : > { %290 = vperm.xlu0 %464, %v287_v1   ;;  %v294_v2 = vld [vmem:[%s271_s25] sm:$0xff]  ;;  %s285_s8 = scalar_lea.vmem %s572_s4, %s537_s19 }
  0x13   : > { %v286_v4 = vld [vmem:[%s263_s28] sm:$0xff] }
  0x14   : > { %v301_v6 = vld [vmem:[%s278_s5] sm:$0xff] }
  0x16   : > { %297 = vperm.xlu0 %464, %v294_v2  }
  0x91   : > { %v291_v3 = vpop.permute.xlu0 %290 }
  0x92   : > { %v293_v5 = vmul.f32 %v291_v3, %v286_v4 }
  0x95   : > { %v298_v7 = vpop.permute.xlu0 %297 }
  0x96   : > { %v300_v8 = vadd.f32 %v298_v7, %v293_v5 }
  0x98   : > { %v302_v9 = vadd.f32 %v301_v6, %v300_v8 }
  0x9a   : > { %v303_v10 = vmin.f32 %v302_v9, 20.0 }
  0x9c   : > { %v304_v11 = vmul.f32 1.442695, %v303_v10 }
  0x9e   : > { %465 = vpow2.f32 %v304_v11 }
  0xa8   : > { %v466_v12 = vpop.eup %465 }
  0xa9   : > { %v306_v13 = vadd.f32 2.0, %v466_v12 }
  0xab   : > { %v307_v14 = vmul.f32 %v466_v12, %v306_v13 }
  0xad   : > { %v308_v15 = vadd.f32 2.0, %v307_v14 }
  0xaf   : > { %467 = vrcp.f32 %v308_v15 }
  0xb9   : > { %v468_v16 = vpop.eup %467 }
  0xba   : > { %v310_v17 = vmul.f32 %v468_v16, %v307_v14 }
  0xbc   : > { %v311_v18 = vmul.f32 %v310_v17, %v302_v9 }
  0xbe   : > { %313 = vst.msk [vmem:[%s285_s8] sm:$0xff] %vm312_vm0, %v311_v18 }
  0xbf PF: > { %s14_s17 = sadd.s32 1, %s491_s17   ;;  %s573_s15 = smov %s487_s16 }
  0xc0   : > { %p11_p5 = scmp.ge.s32.totalorder %s14_s17, 4   ;;  %s574_s16 = smov %s576_s18 }
  0xc2   :  { %13 = sbr.rel (!%p11_p5) target bundleno = 2 (0x2), region = 75 }

</bundles_post_ra>
